<compile_context>
chip_gen: v7x
topology: tpu7x:2x2x1
jax: 0.10.0
libtpu: 0.0.40
codegen_flags: <defaults>
</compile_context>

<pallas_src>
import math
from functools import partial

import jax
import jax.numpy as jnp
from jax.experimental import pallas as pl
from jax.experimental.pallas import tpu as pltpu


# ---------------------------------------------------------------------------
# generation-aware configuration
# ---------------------------------------------------------------------------
def _tpu_config():
    """Returns (scoped vmem limit bytes, max M tile). Conservative fallback is
    v7x-safe (64 MiB physical VMEM per TensorCore)."""
    phys = None
    try:
        info = pltpu.get_tpu_info()
        phys = getattr(info, "vmem_capacity_bytes", None)
    except Exception:
        phys = None
    if phys is None or phys <= 64 * 1024 * 1024:      # v7x-class (or unknown)
        return 40 * 1024 * 1024, 1024
    return 96 * 1024 * 1024, 2048                     # v5e / v6e (128 MiB)


def _round_up(x, m):
    return ((x + m - 1) // m) * m


def _pick_tile(dim, max_tile):
    """dim, max_tile multiples of 128. Returns a divisor of dim in [128, max]."""
    t = max(128, min(max_tile, dim))
    while dim % t:
        t -= 128
    return t


def _pad2(x, rows, cols, dtype=None):
    r, c = x.shape
    if r != rows or c != cols:
        x = jnp.pad(x, ((0, rows - r), (0, cols - c)))
    if dtype is not None and x.dtype != dtype:
        x = x.astype(dtype)
    return x


# ---------------------------------------------------------------------------
# degree kernel: partial row / column sums of the adjacency matrix
# ---------------------------------------------------------------------------
def _degree_kernel(g_ref, col_ref, row_ref):
    g = g_ref[...].astype(jnp.float32)
    # partial column sums of this (tr, tc) tile -> (1, 1, tc) block
    col_ref[...] = jnp.expand_dims(jnp.sum(g, axis=0, keepdims=True), 0)
    # partial row sums of this tile -> (1, tr, 1) block
    row_ref[...] = jnp.expand_dims(jnp.sum(g, axis=1, keepdims=True), 0)


def _degrees(g, vmem_limit):
    """g: (Np, Np) bf16, Np a multiple of 128.
    Returns (col_deg (1, Np), row_deg (Np, 1)) f32, clamped to >= 1."""
    np_ = g.shape[0]
    tr = _pick_tile(np_, 2048)
    tc = _pick_tile(np_, 1024)
    nr, nc = np_ // tr, np_ // tc
    col_part, row_part = pl.pallas_call(
        _degree_kernel,
        out_shape=(jax.ShapeDtypeStruct((nr, 1, np_), jnp.float32),
                   jax.ShapeDtypeStruct((nc, np_, 1), jnp.float32)),
        grid_spec=pltpu.PrefetchScalarGridSpec(
            num_scalar_prefetch=0,
            grid=(nr, nc),
            in_specs=[pl.BlockSpec((tr, tc), lambda i, j: (i, j))],
            out_specs=[pl.BlockSpec((1, 1, tc), lambda i, j: (i, 0, j)),
                       pl.BlockSpec((1, tr, 1), lambda i, j: (j, i, 0))],
        ),
        compiler_params=pltpu.CompilerParams(
            dimension_semantics=("parallel", "parallel"),
            vmem_limit_bytes=vmem_limit,
        ),
        cost_estimate=pl.CostEstimate(
            flops=2 * np_ * np_,
            transcendentals=0,
            bytes_accessed=np_ * np_ * g.dtype.itemsize
                           + 4 * np_ * (nr + nc),
        ),
    )(g)
    # tiny cross-tile reductions + clamp (torch .clamp(min=1)) in plain JAX
    col_deg = jnp.maximum(jnp.sum(col_part, axis=0), 1.0)          # (1, Np)
    row_deg = jnp.maximum(jnp.sum(row_part, axis=0), 1.0)          # (Np, 1)
    return col_deg, row_deg


# ---------------------------------------------------------------------------
# fused scaled matmul: out = so * ((sa * a) @ (sb * b)), bf16 MXU + f32 acc
# ---------------------------------------------------------------------------
def _make_scaled_matmul_kernel(has_sa, has_sb, has_so):
    def kernel(*refs):
        it = iter(refs)
        a_ref = next(it)
        b_ref = next(it)
        sa_ref = next(it) if has_sa else None
        sb_ref = next(it) if has_sb else None
        so_ref = next(it) if has_so else None
        o_ref = next(it)
        acc_ref = next(it)

        k = pl.program_id(2)

        @pl.when(k == 0)
        def _():
            acc_ref[...] = jnp.zeros_like(acc_ref)

        # bf16 MXU operands; scale (when present) applied in f32 before cast
        if has_sa:
            a = (a_ref[...].astype(jnp.float32) * sa_ref[...]).astype(jnp.bfloat16)
        else:
            a = a_ref[...].astype(jnp.bfloat16)
        if has_sb:
            b = (b_ref[...].astype(jnp.float32) * sb_ref[...]).astype(jnp.bfloat16)
        else:
            b = b_ref[...].astype(jnp.bfloat16)
        acc_ref[...] += jnp.dot(a, b, preferred_element_type=jnp.float32)

        @pl.when(k == pl.num_programs(2) - 1)
        def _():
            out = acc_ref[...]
            if has_so:
                out = out * so_ref[...]
            o_ref[...] = out.astype(o_ref.dtype)

    return kernel


def _scaled_matmul(a, b, sa=None, sb=None, so=None, *, out_dtype,
                   max_tm, vmem_limit):
    """All dims must be multiples of 128. sa/so: (M,1) f32, sb: (K,1) f32 (any
    of them may be None -> that scaling code path is not emitted)."""
    m, k = a.shape
    k2, n = b.shape
    assert k == k2
    a_it = jnp.dtype(a.dtype).itemsize
    b_it = jnp.dtype(b.dtype).itemsize
    out_it = jnp.dtype(out_dtype).itemsize

    tk = _pick_tile(k, 512)
    tn = _pick_tile(n, 512)
    tm = _pick_tile(m, max_tm)
    # shrink tm until the double-buffered working set fits the scoped VMEM
    budget = vmem_limit - 8 * 1024 * 1024
    while tm > 128:
        ws = (2 * tm * tk * a_it + 2 * tk * tn * b_it
              + 2 * tm * tn * out_it + tm * tn * 4 + 8 * 4 * (tm + tk))
        if ws <= budget:
            break
        tm = _pick_tile(m, tm - 128)

    in_specs = [pl.BlockSpec((tm, tk), lambda i, j, kk: (i, kk)),
                pl.BlockSpec((tk, tn), lambda i, j, kk: (kk, j))]
    args = [a, b]
    if sa is not None:
        in_specs.append(pl.BlockSpec((tm, 1), lambda i, j, kk: (i, 0)))
        args.append(sa)
    if sb is not None:
        in_specs.append(pl.BlockSpec((tk, 1), lambda i, j, kk: (kk, 0)))
        args.append(sb)
    if so is not None:
        in_specs.append(pl.BlockSpec((tm, 1), lambda i, j, kk: (i, 0)))
        args.append(so)

    kernel = _make_scaled_matmul_kernel(sa is not None, sb is not None,
                                        so is not None)

    return pl.pallas_call(
        kernel,
        out_shape=jax.ShapeDtypeStruct((m, n), out_dtype),
        grid_spec=pltpu.PrefetchScalarGridSpec(
            num_scalar_prefetch=0,
            grid=(m // tm, n // tn, k // tk),
            in_specs=in_specs,
            out_specs=pl.BlockSpec((tm, tn), lambda i, j, kk: (i, j)),
            scratch_shapes=[pltpu.VMEM((tm, tn), jnp.float32)],
        ),
        compiler_params=pltpu.CompilerParams(
            dimension_semantics=("parallel", "parallel", "arbitrary"),
            vmem_limit_bytes=vmem_limit,
        ),
        cost_estimate=pl.CostEstimate(
            flops=2 * m * n * k,
            transcendentals=0,
            # account for the per-tile re-reads of both operands
            bytes_accessed=(m * k * a_it * (n // tn)
                            + k * n * b_it * (m // tm)
                            + m * n * out_it + 4 * (2 * m + k)),
        ),
    )(*args)


# ---------------------------------------------------------------------------
# GraphConvNN.forward
# ---------------------------------------------------------------------------
def graph_conv(graph, feat, weight=None, *, norm="both"):
    """Pallas forward of GraphConvNN (dense adjacency `graph`; module defaults
    bias=False, activation=None; 2-D feat)."""
    if norm not in ("none", "both", "right"):
        raise ValueError(f"invalid norm {norm!r}")
    vmem_limit, max_tm = _tpu_config()

    n = graph.shape[0]
    f_in = feat.shape[1]
    out_dtype = feat.dtype

    n_p = _round_up(n, 128)
    fi_p = _round_up(f_in, 128)
    # A is a 0/1 self-loop-augmented adjacency -> exact in bf16; the MXU
    # consumes bf16 anyway and this halves HBM traffic for the N^2 array.
    # TODO(synk): a generic weighted adjacency would lose mantissa bits here.
    g = _pad2(graph, n_p, n_p, dtype=jnp.bfloat16)
    x = _pad2(feat, n_p, fi_p)

    c_in = None      # per-source-node scale (applied to X rows), norm='both'
    c_out = None     # per-destination-node scale (applied to output rows)
    if norm != "none":                    # degree pass skipped for norm='none'
        col_deg, row_deg = _degrees(g, vmem_limit)
        if norm == "both":
            c_in = jax.lax.rsqrt(col_deg).reshape(n_p, 1)
            c_out = jax.lax.rsqrt(row_deg)
        else:  # 'right'
            c_out = 1.0 / row_deg

    mm = partial(_scaled_matmul, max_tm=max_tm, vmem_limit=vmem_limit)

    if weight is None:
        # aggregation only: c_out * (A @ (c_in * X))
        rst = mm(g, x, sb=c_in, so=c_out, out_dtype=out_dtype)
        return rst[:n, :f_in]

    f_out = weight.shape[1]
    fo_p = _round_up(f_out, 128)
    w = _pad2(weight, fi_p, fo_p)

    # intermediate kept in bf16: it is consumed as a bf16 MXU operand anyway,
    # and this halves its HBM round trip.
    if f_in > f_out:
        h = mm(x, w, sa=c_in, out_dtype=jnp.bfloat16)          # (c_in*X) @ W
        rst = mm(g, h, so=c_out, out_dtype=out_dtype)          # c_out*(A @ h)
    else:
        agg = mm(g, x, sb=c_in, out_dtype=jnp.bfloat16)        # A @ (c_in*X)
        rst = mm(agg, w, so=c_out, out_dtype=out_dtype)        # c_out*(agg@W)

    # module defaults: bias=False, activation=None -> no epilogue needed
    return rst[:n, :f_out]


# ---------------------------------------------------------------------------
# self-test
# ---------------------------------------------------------------------------
def _reference(graph, feat, weight, norm):
    f_in = feat.shape[1]
    if norm == "both":
        degs = jnp.maximum(graph.sum(axis=-2), 1.0)
        feat = feat * (degs ** -0.5)[:, None]
    if weight is not None and f_in > weight.shape[1]:
        rst = graph @ (feat @ weight)
    else:
        rst = graph @ feat
        if weight is not None:
            rst = rst @ weight
    if norm != "none":
        degs = jnp.maximum(graph.sum(axis=-1), 1.0)
        nrm = degs ** -0.5 if norm == "both" else 1.0 / degs
        rst = rst * nrm[:, None]
    return rst


if __name__ == "__main__":
    key = jax.random.PRNGKey(0)
    k1, k2, k3, k4, k5 = jax.random.split(key, 5)

    N = 96
    a = (jax.random.uniform(k1, (N, N)) < 0.15).astype(jnp.float32)
    graph = jnp.maximum(jnp.maximum(a, a.T), jnp.eye(N, dtype=jnp.float32))

    def glorot(k, fi, fo):
        lim = math.sqrt(6.0 / (fi + fo))
        return jax.random.uniform(k, (fi, fo), jnp.float32, -lim, lim)

    ok = True

    # case 1: norm='both', in_feats > out_feats (module defaults)
    F_IN, F_OUT = 160, 48
    feat = jax.random.normal(k2, (N, F_IN), dtype=jnp.float32)
    weight = glorot(k3, F_IN, F_OUT)
    y = graph_conv(graph, feat, weight, norm="both")
    jax.block_until_ready(y)
    ref = _reference(graph, feat, weight, "both")
    assert y.shape == (N, F_OUT)
    ok &= bool(jnp.allclose(y, ref, atol=2e-2, rtol=2e-2))

    # case 2: norm='right', in_feats <= out_feats
    F_IN2, F_OUT2 = 48, 160
    feat2 = jax.random.normal(k4, (N, F_IN2), dtype=jnp.float32)
    weight2 = glorot(k5, F_IN2, F_OUT2)
    y2 = graph_conv(graph, feat2, weight2, norm="right")
    jax.block_until_ready(y2)
    ref2 = _reference(graph, feat2, weight2, "right")
    assert y2.shape == (N, F_OUT2)
    ok &= bool(jnp.allclose(y2, ref2, atol=2e-2, rtol=2e-2))

    # case 3: weight=False (aggregation only), norm='both'
    y3 = graph_conv(graph, feat2, None, norm="both")
    jax.block_until_ready(y3)
    ref3 = _reference(graph, feat2, None, "both")
    assert y3.shape == (N, F_IN2)
    ok &= bool(jnp.allclose(y3, ref3, atol=2e-2, rtol=2e-2))

    assert ok, "mismatch vs pure-JAX reference"
    print("KERNEL_OK")
</pallas_src>

<mosaic_0001>
module attributes {stable_mosaic.version = 11 : i64} {
  func.func @_degree_kernel(%arg0: i32, %arg1: i32, %arg2: memref<128x128xbf16, #tpu.memory_space<vmem>>, %arg3: memref<1x1x128xf32, #tpu.memory_space<vmem>>, %arg4: memref<1x128x1xf32, #tpu.memory_space<vmem>>) attributes {dimension_semantics = [#tpu.dimension_semantics<parallel>, #tpu.dimension_semantics<parallel>], iteration_bounds = array<i64: 1, 1>, scalar_prefetch = 0 : i64, scratch_operands = 0 : i64, tpu.core_type = #tpu.core_type<tc>, window_params = [{transform_indices = @transform_0, window_bounds = array<i64: 128, 128>}, {transform_indices = @transform_1, window_bounds = array<i64: 1, 1, 128>}, {transform_indices = @transform_2, window_bounds = array<i64: 1, 128, 1>}]} {
    %c0 = arith.constant 0 : index
    %c0_0 = arith.constant 0 : index
    %0 = vector.load %arg2[%c0, %c0_0] : memref<128x128xbf16, #tpu.memory_space<vmem>>, vector<128x128xbf16>
    %1 = arith.extf %0 : vector<128x128xbf16> to vector<128x128xf32>
    %cst = arith.constant dense<0.000000e+00> : vector<128xf32>
    %2 = vector.multi_reduction <add>, %1, %cst [0] : vector<128x128xf32> to vector<128xf32>
    %3 = vector.shape_cast %2 : vector<128xf32> to vector<1x128xf32>
    %4 = vector.shape_cast %3 : vector<1x128xf32> to vector<1x1x128xf32>
    %c0_1 = arith.constant 0 : index
    %c0_2 = arith.constant 0 : index
    %c0_3 = arith.constant 0 : index
    %5 = vector.load %arg3[%c0_1, %c0_2, %c0_3] : memref<1x1x128xf32, #tpu.memory_space<vmem>>, vector<1x1x128xf32>
    tpu.vector_store %arg3[%c0_1, %c0_2, %c0_3], %4 {strides = array<i32>} : memref<1x1x128xf32, #tpu.memory_space<vmem>>, vector<1x1x128xf32>,
    %cst_4 = arith.constant dense<0.000000e+00> : vector<128xf32>
    %6 = vector.multi_reduction <add>, %1, %cst_4 [1] : vector<128x128xf32> to vector<128xf32>
    %7 = vector.shape_cast %6 : vector<128xf32> to vector<128x1xf32>
    %8 = vector.shape_cast %7 : vector<128x1xf32> to vector<1x128x1xf32>
    %c0_5 = arith.constant 0 : index
    %c0_6 = arith.constant 0 : index
    %c0_7 = arith.constant 0 : index
    %9 = vector.load %arg4[%c0_5, %c0_6, %c0_7] : memref<1x128x1xf32, #tpu.memory_space<vmem>>, vector<1x128x1xf32>
    tpu.vector_store %arg4[%c0_5, %c0_6, %c0_7], %8 {strides = array<i32>} : memref<1x128x1xf32, #tpu.memory_space<vmem>>, vector<1x128x1xf32>,
    return
  }
  func.func @transform_0(%arg0: i32, %arg1: i32) -> (i32, i32) {
    %c0_i32 = arith.constant 0 : i32
    return %arg0, %arg1 : i32, i32
  }
  func.func @transform_1(%arg0: i32, %arg1: i32) -> (i32, i32, i32) {
    %c0_i32 = arith.constant 0 : i32
    %c0_i32_0 = arith.constant 0 : i32
    return %arg0, %c0_i32, %arg1 : i32, i32, i32
  }
  func.func @transform_2(%arg0: i32, %arg1: i32) -> (i32, i32, i32) {
    %c0_i32 = arith.constant 0 : i32
    %c0_i32_0 = arith.constant 0 : i32
    return %arg1, %arg0, %c0_i32 : i32, i32, i32
  }
}

</mosaic_0001>

<bundles_post_ra>
// kernel: tpu_custom_call.1
= control target key start
LH: loop header
LB: loop body
LE: loop exit
PB: predicated region body
PF: predicated region fallthrough
CT: control target
= control target key end

     0   :  { %8 = vsyncpa [#allocation3], 0  ;;  %s345_s0 = inlined_call_operand.hbm [shape: bf16[128,128], index: 0, kind: input, shape index: {}]   ;;  %s346_s1 = inlined_call_operand.hbm [shape: f32[1,1,128], index: 1, kind: output, shape index: {0}]   ;;  %s347_s2 = inlined_call_operand.vmem [shape: f32[1,128,1], index: 2, kind: output, shape index: {1}]  }
   0x1   :  { %9 = vsyncpa [#allocation4], 0  ;;  %s238_s9 = smov [#allocation2]   ;;  %s190_s13 = scalar_lea.hbm %s345_s0, 1024 }
   0x2   :  { %s15_s10 = sshll.u32 %s238_s9, 4  ;;  %p191_p0 = scmp.ne.s32.totalorder %s345_s0, %s190_s13  ;;  %s16_s10 = int_to_ptr.vmem [resolvable:$true] %s15_s10 }
   0x3   :  { %p194_p1 = scmp.lt.u32.totalorder %s190_s13, %s345_s0 }
   0x5   :  { %p196_p2 = pnand %p194_p1, %p191_p0 }
   0x7   :  { %199 = shalt.err (!%p196_p2)
}
   0x8   :  { %s200_s18 = scalar_lea.vmem %s16_s10, 1024  ;;  %p205_p4 = scmp.lt.s32.totalorder %s16_s10, %s16_s10 }
   0x9   :  { %p201_p3 = scmp.ne.s32.totalorder %s16_s10, %s200_s18  ;;  %p206_p5 = scmp.lt.s32.totalorder %s200_s18, %s200_s18 }
   0xb   :  { %p207_p6 = por %p206_p5, %p205_p4 }
   0xd   :  { %p208_p7 = pnand %p207_p6, %p201_p3 }
   0xf   :  { %211 = shalt.err (!%p208_p7)
}
  0x10   :  { %s239_s19 = smov 64   ;;  %s240_s20 = smov 4  }
  0x11   :  { %21 = dma.hbm_to_vmem [thread:$0]  %s345_s0, 1024, %s16_s10, [#allocation3], %s239_s19, %s239_s19, %s240_s20  }
  0x12   :  { %234 = dma.done.wait [#allocation3], 1024  }
  0x13   :  { %235 = vsyncadd [#allocation3], 4294966272  ;;  %v179_v0 = vld [vmem:[#allocation2 + $0x8] sm:$0xff]   ;;  %v148_v1 = vld [vmem:[#allocation2] sm:$0xff]   ;;  %s241_s0 = smov [#allocation5]  }
  0x14   :  { %v153_v2 = vunpack.c.l.bf16 %v179_v0  ;;  %v149_v3 = vunpack.c.l.bf16 %v148_v1  ;;  %v150_v4 = vunpack.c.h.bf16 %v148_v1  ;;  %v154_v5 = vunpack.c.h.bf16 %v179_v0  ;;  %v180_v7 = vld [vmem:[#allocation2 + $0x10] sm:$0xff]   ;;  %v181_v12 = vld [vmem:[#allocation2 + $0x18] sm:$0xff]   ;;  %v182_v17 = vld [vmem:[#allocation2 + $0x20] sm:$0xff]   ;;  %s134_s23 = sshll.u32 %s241_s0, 4  ;;  %s135_s23 = int_to_ptr.vmem [resolvable:$true] %s134_s23 }
  0x15   :  { %v158_v9 = vunpack.c.h.bf16 %v180_v7  ;;  %v157_v10 = vunpack.c.l.bf16 %v180_v7  ;;  %v162_v14 = vunpack.c.h.bf16 %v181_v12  ;;  %v161_v15 = vunpack.c.l.bf16 %v181_v12  ;;  %v183_v22 = vld [vmem:[#allocation2 + $0x28] sm:$0xff]   ;;  %v184_v27 = vld [vmem:[#allocation2 + $0x30] sm:$0xff]   ;;  %v185_v32 = vld [vmem:[#allocation2 + $0x38] sm:$0xff]   ;;  %s212_s24 = scalar_lea.vmem %s135_s23, 16  ;;  %s216_s25 = scalar_lea.vmem %s135_s23, 32 }
  0x16   :  { %83 = vadd.xlane.f32.xlu1 %v153_v2  ;;  %79 = vadd.xlane.f32.xlu0 %v149_v3  ;;  %v57_v6 = vadd.f32 %v150_v4, %v149_v3  ;;  %v166_v19 = vunpack.c.h.bf16 %v182_v17  ;;  %v165_v20 = vunpack.c.l.bf16 %v182_v17  ;;  %v170_v24 = vunpack.c.h.bf16 %v183_v22  ;;  %p213_p8 = scmp.ne.s32.totalorder %s135_s23, %s212_s24  ;;  %p217_p9 = scmp.lt.s32.totalorder %s135_s23, %s135_s23 }
  0x17   :  { %v169_v25 = vunpack.c.l.bf16 %v183_v22  ;;  %v174_v29 = vunpack.c.h.bf16 %v184_v27  ;;  %v173_v30 = vunpack.c.l.bf16 %v184_v27  ;;  %v178_v34 = vunpack.c.h.bf16 %v185_v32  ;;  %p218_p10 = scmp.lt.s32.totalorder %s216_s25, %s212_s24 }
  0x18   :  { %v58_v8 = vadd.f32 %v153_v2, %v57_v6  ;;  %v177_v35 = vunpack.c.l.bf16 %v185_v32 }
  0x19   :  { %p219_p11 = por %p218_p10, %p217_p9 }
  0x1a   :  { %85 = vadd.xlane.f32.xlu1 %v154_v5  ;;  %81 = vadd.xlane.f32.xlu0 %v150_v4  ;;  %v59_v11 = vadd.f32 %v154_v5, %v58_v8 }
  0x1b   :  { %p220_p12 = pnand %p219_p11, %p213_p8 }
  0x1c   :  { %v60_v13 = vadd.f32 %v157_v10, %v59_v11 }
  0x1e   :  { %89 = vadd.xlane.f32.xlu1 %v158_v9  ;;  %87 = vadd.xlane.f32.xlu0 %v157_v10  ;;  %v61_v16 = vadd.f32 %v158_v9, %v60_v13 }
  0x20   :  { %v62_v18 = vadd.f32 %v161_v15, %v61_v16 }
  0x22   :  { %93 = vadd.xlane.f32.xlu1 %v162_v14  ;;  %91 = vadd.xlane.f32.xlu0 %v161_v15  ;;  %v63_v21 = vadd.f32 %v162_v14, %v62_v18 }
  0x24   :  { %v64_v23 = vadd.f32 %v165_v20, %v63_v21 }
  0x26   :  { %97 = vadd.xlane.f32.xlu1 %v166_v19  ;;  %95 = vadd.xlane.f32.xlu0 %v165_v20  ;;  %v65_v26 = vadd.f32 %v166_v19, %v64_v23 }
  0x28   :  { %v66_v28 = vadd.f32 %v169_v25, %v65_v26 }
  0x2a   :  { %101 = vadd.xlane.f32.xlu1 %v170_v24  ;;  %99 = vadd.xlane.f32.xlu0 %v169_v25  ;;  %v67_v31 = vadd.f32 %v170_v24, %v66_v28 }
  0x2c   :  { %v68_v33 = vadd.f32 %v173_v30, %v67_v31 }
  0x2e   :  { %105 = vadd.xlane.f32.xlu1 %v174_v29  ;;  %103 = vadd.xlane.f32.xlu0 %v173_v30  ;;  %v69_v36 = vadd.f32 %v174_v29, %v68_v33 }
  0x30   :  { %v70_v37 = vadd.f32 %v177_v35, %v69_v36 }
  0x32   :  { %109 = vadd.xlane.f32.xlu1 %v178_v34  ;;  %107 = vadd.xlane.f32.xlu0 %v177_v35  ;;  %v71_v38 = vadd.f32 %v178_v34, %v70_v37 }
  0x34   :  { %v72_v39 = vrot.slane %v71_v38, 4 }
  0x36   :  { %v73_v40 = vadd.f32 %v72_v39, %v71_v38 }
  0x38   :  { %v74_v41 = vrot.slane %v73_v40, 2 }
  0x3a   :  { %v75_v42 = vadd.f32 %v74_v41, %v73_v40 }
  0x3c   :  { %v76_v43 = vrot.slane %v75_v42, 1 }
  0x3e   :  { %v77_v44 = vadd.f32 %v76_v43, %v75_v42 }
  0x40   :  { %78 = vst [vmem:[#allocation5] sm:$0x1] %v77_v44 }
  0x41   :  { %223 = shalt.err (!%p220_p12)
}
  0x42   :  { %s224_s28 = scalar_lea.hbm %s346_s1, 16 }
  0x43   :  { %p225_p13 = scmp.ne.s32.totalorder %s346_s1, %s224_s28  ;;  %p228_p0 = scmp.lt.u32.totalorder %s224_s28, %s346_s1 }
  0x45   :  { %p230_p1 = pnand %p228_p0, %p225_p13 }
  0x47   :  { %233 = shalt.err (!%p230_p1)
}
  0x48   :  { %137 = dma.vmem_to_hbm [thread:$0]  %s135_s23, 16, %s346_s1, [#allocation4]   ;;  %vm111_vm0 = vcmask 7168  }
  0xa3   :  { %v84_v45 = vpop.xlane.xlu1 %83  ;;  %v80_v46 = vpop.xlane.xlu0 %79 }
  0xa4   :  { %114 = vst.msk [vmem:[%s347_s2 + $0x10] sm:$0xff] %vm111_vm0, %v84_v45  ;;  %112 = vst.msk [vmem:[%s347_s2] sm:$0xff] %vm111_vm0, %v80_v46 }
  0xa7   :  { %v86_v47 = vpop.xlane.xlu1 %85  ;;  %v82_v48 = vpop.xlane.xlu0 %81 }
  0xa8   :  { %115 = vst.msk [vmem:[%s347_s2 + $0x18] sm:$0xff] %vm111_vm0, %v86_v47  ;;  %113 = vst.msk [vmem:[%s347_s2 + $0x8] sm:$0xff] %vm111_vm0, %v82_v48 }
  0xab   :  { %v90_v49 = vpop.xlane.xlu1 %89  ;;  %v88_v50 = vpop.xlane.xlu0 %87 }
  0xac   :  { %117 = vst.msk [vmem:[%s347_s2 + $0x28] sm:$0xff] %vm111_vm0, %v90_v49  ;;  %116 = vst.msk [vmem:[%s347_s2 + $0x20] sm:$0xff] %vm111_vm0, %v88_v50 }
  0xaf   :  { %v94_v51 = vpop.xlane.xlu1 %93  ;;  %v92_v52 = vpop.xlane.xlu0 %91 }
  0xb0   :  { %119 = vst.msk [vmem:[%s347_s2 + $0x38] sm:$0xff] %vm111_vm0, %v94_v51  ;;  %118 = vst.msk [vmem:[%s347_s2 + $0x30] sm:$0xff] %vm111_vm0, %v92_v52 }
  0xb3   :  { %v98_v53 = vpop.xlane.xlu1 %97  ;;  %v96_v54 = vpop.xlane.xlu0 %95 }
  0xb4   :  { %121 = vst.msk [vmem:[%s347_s2 + $0x48] sm:$0xff] %vm111_vm0, %v98_v53  ;;  %120 = vst.msk [vmem:[%s347_s2 + $0x40] sm:$0xff] %vm111_vm0, %v96_v54 }
  0xb7   :  { %v102_v55 = vpop.xlane.xlu1 %101  ;;  %v100_v56 = vpop.xlane.xlu0 %99 }
  0xb8   :  { %123 = vst.msk [vmem:[%s347_s2 + $0x58] sm:$0xff] %vm111_vm0, %v102_v55  ;;  %122 = vst.msk [vmem:[%s347_s2 + $0x50] sm:$0xff] %vm111_vm0, %v100_v56 }
  0xbb   :  { %v106_v57 = vpop.xlane.xlu1 %105  ;;  %v104_v58 = vpop.xlane.xlu0 %103 }
  0xbc   :  { %125 = vst.msk [vmem:[%s347_s2 + $0x68] sm:$0xff] %vm111_vm0, %v106_v57  ;;  %124 = vst.msk [vmem:[%s347_s2 + $0x60] sm:$0xff] %vm111_vm0, %v104_v58 }
  0xbf   :  { %v110_v59 = vpop.xlane.xlu1 %109  ;;  %v108_v60 = vpop.xlane.xlu0 %107 }
  0xc0   :  { %127 = vst.msk [vmem:[%s347_s2 + $0x78] sm:$0xff] %vm111_vm0, %v110_v59  ;;  %126 = vst.msk [vmem:[%s347_s2 + $0x70] sm:$0xff] %vm111_vm0, %v108_v60 }
  0xc1   :  { %236 = dma.done.wait [#allocation4], 16  }
  0xc2   :  { %237 = vsyncadd [#allocation4], 4294967280 }
  0xc3   :  { %145 = vsyncpa [#allocation3], 1 }
  0xc4   :  { %146 = vsyncpa [#allocation4], 1 }

</bundles_post_ra>
